<compile_context>
chip_gen: v7x
topology: tpu7x:2x2x1
jax: 0.10.0
libtpu: 0.0.40
codegen_flags: <defaults>
</compile_context>

<pallas_src>
import functools

import jax
import jax.numpy as jnp
from jax.experimental import pallas as pl
from jax.experimental.pallas import tpu as pltpu


def _linear_kernel(x_ref, w_ref, b_ref, o_ref):
    # x_ref: (tm, D) f32 | w_ref: (D, C) f32 | b_ref: (1, C) f32 | o_ref: (tm, C) f32
    acc = jnp.dot(x_ref[...], w_ref[...], preferred_element_type=jnp.float32)
    o_ref[...] = (acc + b_ref[...]).astype(o_ref.dtype)


@functools.partial(jax.jit, static_argnames=("tm",))
def survival_mlp_forward(x, weight, bias, *, tm=1024):
    """Equivalent of SurvivalMLP.forward: logits = x @ weight.T + bias.

    x:      (B, D)  float32
    weight: (C, D)  float32   (PyTorch nn.Linear convention, NOT transposed)
    bias:   (C,)    float32
    returns (B, C)  float32
    """
    B, D = x.shape
    C = weight.shape[0]

    # --- Batch tiling -------------------------------------------------------
    # Round tiny batches up to a sublane multiple; cap tile at tm.
    b_sub = max(8, pl.cdiv(B, 8) * 8)
    tm = min(tm, b_sub)
    # For large batches, keep at least 2 grid blocks so the "parallel" batch
    # axis can be sharded across the two TensorCores on v7x.
    if b_sub >= 1024:
        tm = min(tm, pl.cdiv(b_sub // 2, 8) * 8)
    B_pad = pl.cdiv(B, tm) * tm

    x_p = x if B_pad == B else jnp.pad(x, ((0, B_pad - B), (0, 0)))
    w_t = weight.T                      # (D, C): one-time tiny transpose in wrapper
    b_r = bias.reshape(1, C)

    grid = (B_pad // tm,)

    out = pl.pallas_call(
        _linear_kernel,
        out_shape=jax.ShapeDtypeStruct((B_pad, C), jnp.float32),
        grid_spec=pl.GridSpec(
            grid=grid,
            in_specs=[
                pl.BlockSpec((tm, D), lambda i: (i, 0)),   # x tile moves with i
                pl.BlockSpec((D, C), lambda i: (0, 0)),    # weight resident in VMEM
                pl.BlockSpec((1, C), lambda i: (0, 0)),    # bias resident in VMEM
            ],
            out_specs=pl.BlockSpec((tm, C), lambda i: (i, 0)),
        ),
        compiler_params=pltpu.CompilerParams(
            dimension_semantics=("parallel",),   # batch tiles shard across TCs (v7x)
        ),
        cost_estimate=pl.CostEstimate(
            flops=2 * B_pad * D * C,
            transcendentals=0,
            bytes_accessed=(
                x_p.size * x_p.dtype.itemsize
                + w_t.size * w_t.dtype.itemsize
                + b_r.size * 4
                + B_pad * C * 4
            ),
        ),
    )(x_p, w_t, b_r)

    return out if B_pad == B else out[:B]


if __name__ == "__main__":
    # Small shapes consistent with the module: input_dim features -> num_classes bins
    B, input_dim, num_classes = 8, 32, 4

    key = jax.random.PRNGKey(0)
    kx, kw, kb = jax.random.split(key, 3)

    # Deterministic synthetic parameters (nn.Linear(input_dim, num_classes) shapes)
    x = jax.random.normal(kx, (B, input_dim), dtype=jnp.float32)
    weight = jax.random.normal(kw, (num_classes, input_dim), dtype=jnp.float32) * 0.05
    bias = jax.random.normal(kb, (num_classes,), dtype=jnp.float32) * 0.05

    logits = survival_mlp_forward(x, weight, bias)
    logits = jax.block_until_ready(logits)

    # Full-f32 PyTorch-Linear reference (highest precision to avoid XLA's
    # default bf16-pass dot skewing the reference itself).
    ref = jnp.dot(x, weight.T, precision=jax.lax.Precision.HIGHEST) + bias

    assert logits.shape == (B, num_classes)
    assert jnp.allclose(logits, ref, atol=5e-3, rtol=1e-2), (
        f"max abs err = {jnp.max(jnp.abs(logits - ref))}"
    )

    print("KERNEL_OK")
</pallas_src>

<mosaic_0001>
module attributes {stable_mosaic.version = 11 : i64} {
  func.func @_linear_kernel(%arg0: i32, %arg1: memref<8x32xf32, #tpu.memory_space<vmem>>, %arg2: memref<32x4xf32, #tpu.memory_space<vmem>>, %arg3: memref<1x4xf32, #tpu.memory_space<vmem>>, %arg4: memref<8x4xf32, #tpu.memory_space<vmem>>) attributes {dimension_semantics = [#tpu.dimension_semantics<parallel>], iteration_bounds = array<i64: 1>, scalar_prefetch = 0 : i64, scratch_operands = 0 : i64, tpu.core_type = #tpu.core_type<tc>, window_params = [{transform_indices = @transform_0, window_bounds = array<i64: 8, 32>}, {pipeline_mode = #tpu.pipeline_mode<synchronous>, transform_indices = @transform_1, window_bounds = array<i64: 32, 4>}, {pipeline_mode = #tpu.pipeline_mode<synchronous>, transform_indices = @transform_2, window_bounds = array<i64: 1, 4>}, {transform_indices = @transform_3, window_bounds = array<i64: 8, 4>}]} {
    %c0 = arith.constant 0 : index
    %c0_0 = arith.constant 0 : index
    %0 = vector.load %arg1[%c0, %c0_0] : memref<8x32xf32, #tpu.memory_space<vmem>>, vector<8x32xf32>
    %c0_1 = arith.constant 0 : index
    %c0_2 = arith.constant 0 : index
    %1 = vector.load %arg2[%c0_1, %c0_2] : memref<32x4xf32, #tpu.memory_space<vmem>>, vector<32x4xf32>
    %cst = arith.constant dense<0.000000e+00> : vector<8x4xf32>
    %2 = tpu.matmul %0, %1, %cst {dimension_numbers = #tpu.dot_dimension_numbers<[1], [0], [0], [1], [0, 0, 1, 1], [], []>} : vector<8x32xf32>, vector<32x4xf32>, vector<8x4xf32> -> vector<8x4xf32>
    %c0_3 = arith.constant 0 : index
    %c0_4 = arith.constant 0 : index
    %3 = vector.load %arg3[%c0_3, %c0_4] : memref<1x4xf32, #tpu.memory_space<vmem>>, vector<1x4xf32>
    %4 = vector.broadcast %3 : vector<1x4xf32> to vector<8x4xf32>
    %5 = arith.addf %2, %4 : vector<8x4xf32>
    %c0_5 = arith.constant 0 : index
    %c0_6 = arith.constant 0 : index
    %6 = vector.load %arg4[%c0_5, %c0_6] : memref<8x4xf32, #tpu.memory_space<vmem>>, vector<8x4xf32>
    tpu.vector_store %arg4[%c0_5, %c0_6], %5 {strides = array<i32>} : memref<8x4xf32, #tpu.memory_space<vmem>>, vector<8x4xf32>,
    return
  }
  func.func @transform_0(%arg0: i32) -> (i32, i32) {
    %c0_i32 = arith.constant 0 : i32
    %c0_i32_0 = arith.constant 0 : i32
    return %arg0, %c0_i32 : i32, i32
  }
  func.func @transform_1(%arg0: i32) -> (i32, i32) {
    %c0_i32 = arith.constant 0 : i32
    %c0_i32_0 = arith.constant 0 : i32
    %c0_i32_1 = arith.constant 0 : i32
    return %c0_i32, %c0_i32_0 : i32, i32
  }
  func.func @transform_2(%arg0: i32) -> (i32, i32) {
    %c0_i32 = arith.constant 0 : i32
    %c0_i32_0 = arith.constant 0 : i32
    %c0_i32_1 = arith.constant 0 : i32
    return %c0_i32, %c0_i32_0 : i32, i32
  }
  func.func @transform_3(%arg0: i32) -> (i32, i32) {
    %c0_i32 = arith.constant 0 : i32
    %c0_i32_0 = arith.constant 0 : i32
    return %arg0, %c0_i32 : i32, i32
  }
}

</mosaic_0001>

<bundles_post_ra>
// kernel: survival_mlp_forward.1
= control target key start
LH: loop header
LB: loop body
LE: loop exit
PB: predicated region body
PF: predicated region fallthrough
CT: control target
= control target key end

     0   :  { %v133_v0 = vmov 0.0|0.0   ;;  %vm134_vm0 = vmmov 0   ;;  %v135_v4 = vmov 0.0   ;;  %vm26_vm1 = vcmask 261120   ;;  %s177_s1 = inlined_call_operand.vmem [shape: f32[32,4], index: 1, kind: input, shape index: {}]   ;;  %s178_s0 = inlined_call_operand.vmem [shape: f32[8,32], index: 0, kind: input, shape index: {}]   ;;  %s179_s2 = inlined_call_operand.vmem [shape: f32[1,4], index: 2, kind: input, shape index: {}]   ;;  %s180_s3 = inlined_call_operand.vmem [shape: f32[8,4], index: 3, kind: output, shape index: {}]  }
   0x1   :  { %124 = vmatprep.subr.bf16.mxu0 %v133_v0  ;;  %v15_v1 = vld [vmem:[%s177_s1] sm:$0xff]  ;;  %v16_v2 = vld [vmem:[%s177_s1 + $0x8] sm:$0xff]  ;;  %v17_v3 = vld [vmem:[%s177_s1 + $0x10] sm:$0xff]  ;;  %121 = vmatprep.mubr.msk.f32.mxu0 %vm134_vm0, %v135_v4  ;;  %vm100_vm2 = vcmask 31744  }
   0x2   :  { %v125_v5 = vpack.c.bf16 %v16_v2, %v15_v1  ;;  %v18_v6 = vld [vmem:[%s177_s1 + $0x18] sm:$0xff]  ;;  %v14_v8 = vld [vmem:[%s178_s0] sm:$0xff] }
   0x3   :  { %v128_v7 = vpack.c.bf16 %v18_v6, %v17_v3  ;;  %v106_v9 = vld [vmem:[%s179_s2] ss:$0 sm:$0xff] }
   0x4   :  { %126 = vmatpush3.bf16.msra.mxu0 %v125_v5 }
   0x5   :  { %127 = vmatprep.subr.bf16.mxu0 %v133_v0 }
   0x8   :  { %129 = vmatpush3.bf16.msra.mxu0 %v128_v7 }
   0xb   :  { %122 = vmatmul.mubr.msk.f32.vlgmr.msra.gmra.mrb[0].mxu0 %vm26_vm1, %v14_v8 }
  0xde   :  { %v96_v10 = vpop.f32.mrb[0].mxu0 }
  0xdf   :  { %v97_v11 = vadd.f32 %v106_v9, %v96_v10  ;;  %v123_v12 = vpop.f32.mrb[1].mxu0 }
  0xe1   :  { %101 = vst.msk [vmem:[%s180_s3] sm:$0xff] %vm100_vm2, %v97_v11 }

</bundles_post_ra>
